<compile_context>
chip_gen: v6e
topology: v6e:2x2x1
jax: 0.10.0
libtpu: 0.0.40
codegen_flags: <defaults>
</compile_context>

<pallas_src>
import jax
import jax.numpy as jnp
from jax import lax
from jax.experimental import pallas as pl
from jax.experimental.pallas import tpu as pltpu

_LANES = 128
_DEFAULT_MAX_BLOCK_BYTES = 8 * 1024 * 1024   # target output block (double-buffered)
_VMEM_LIMIT_BYTES = 48 * 1024 * 1024         # scoped VMEM limit (fits v7x 64 MiB)
_ROW_ALIGN = 32          # satisfies native sublane tiling for f32/bf16/int8 blocks
_MIN_SPLIT_BYTES = 2 * 1024 * 1024           # above this, force a multi-step grid
_MIN_STEPS = 4                               # ... with at least this many steps
_CHUNK_ROWS = 256        # in-kernel compute chunk (bounds unrolled code size)
_DEPTH_TILE = 1024       # lane-dense column tile for vocab-scale depth
_MAX_FULL_DEPTH = 2048   # above this (lane-padded), tile the depth axis


# ----------------------------- helpers --------------------------------------


def _round_up(x, m):
    return -(-x // m) * m


def _or_tree(terms):
    """Balanced logical-OR reduction of a list of bool arrays."""
    while len(terms) > 1:
        nxt = [terms[i] | terms[i + 1] for i in range(0, len(terms) - 1, 2)]
        if len(terms) % 2:
            nxt.append(terms[-1])
        terms = nxt
    return terms[0]


def _for_row_chunks(total_rows, chunk, body):
    """Run body(row0, rows) over [0, total_rows) in `chunk`-row pieces.

    Keeps per-piece unrolled code size / live vregs bounded while the Pallas
    block (DMA granularity) stays large.  `rows` is always a static int.
    """
    n_full = total_rows // chunk
    rem = total_rows - n_full * chunk
    if n_full > 0:
        @pl.loop(0, n_full)
        def _(c):
            body(pl.multiple_of(c * chunk, chunk), chunk)
    if rem:
        body(n_full * chunk, rem)


def _pick_row_tile(rows, out_row_bytes, max_block_bytes):
    """Rows per grid step: biggest aligned tile within max_block_bytes of
    output, but keep >= _MIN_STEPS grid steps once the total output is
    non-trivial so both v7x TensorCores get work and DMA can overlap."""
    cap = max(_ROW_ALIGN,
              (max_block_bytes // out_row_bytes) // _ROW_ALIGN * _ROW_ALIGN)
    tile = rows if rows <= cap else cap
    if rows * out_row_bytes > _MIN_SPLIT_BYTES and rows > _ROW_ALIGN:
        per_step = _round_up(pl.cdiv(rows, _MIN_STEPS), _ROW_ALIGN)
        tile = min(tile, max(_ROW_ALIGN, per_step))
    return tile


# ----------------------------- kernels --------------------------------------


def _onehot_packed_kernel(tgt_ref, out_ref):
    """Lane-dense layout: `pack = 128 // depth` one-hot rows per output row.

    tgt_ref: (T, pack) int8, value = target lane (idx + slot*depth) or -1.
    out_ref: (T, 128).
    """
    tile_r = out_ref.shape[0]
    pack = tgt_ref.shape[1]

    def body(row0, rows):
        lanes = lax.broadcasted_iota(jnp.int32, (rows, _LANES), 1)
        tgt = tgt_ref[pl.ds(row0, rows), :].astype(jnp.int32)
        # Independent per-slot compares, OR-reduced in a balanced tree.
        hit = _or_tree([lanes == tgt[:, s:s + 1] for s in range(pack)])
        out_ref[pl.ds(row0, rows), :] = hit.astype(out_ref.dtype)

    _for_row_chunks(tile_r, _CHUNK_ROWS, body)


def _onehot_rowmajor_kernel(idx_ref, out_ref):
    """Row-major layout: idx (T, 1) int32 -> out (T, tile_d), the columns
    [j*tile_d, j*tile_d + tile_d) of the one-hot matrix (j = depth grid axis).
    """
    tile_n, tile_d = out_ref.shape
    col0 = pl.program_id(1) * tile_d
    chunk = max(8, (_CHUNK_ROWS * _LANES // max(tile_d, _LANES)) // 8 * 8)

    def body(row0, rows):
        cols = col0 + lax.broadcasted_iota(jnp.int32, (rows, tile_d), 1)
        out_ref[pl.ds(row0, rows), :] = (
            cols == idx_ref[pl.ds(row0, rows), :]).astype(out_ref.dtype)

    _for_row_chunks(tile_n, chunk, body)


# ----------------------------- wrapper ---------------------------------------


def one_hot(indices, depth, dtype=jnp.float32,
            max_block_bytes=_DEFAULT_MAX_BLOCK_BYTES):
    """Equivalent of OneHot(depth)(indices): one-hot of shape indices.shape + (depth,)."""
    orig_shape = indices.shape
    idx_flat = indices.reshape(-1).astype(jnp.int32)
    n = idx_flat.shape[0]
    if n == 0:
        return jnp.zeros(orig_shape + (depth,), dtype)

    itemsize = jnp.dtype(dtype).itemsize
    use_packed = (4 <= depth < _LANES) and (_LANES % depth == 0)

    if use_packed:
        # ---- lane-dense packed path: `pack` one-hot rows per 128-lane row ----
        pack = _LANES // depth
        r = pl.cdiv(n, pack)
        n_pad = r * pack
        idx = idx_flat if n_pad == n else jnp.pad(idx_flat, (0, n_pad - n))
        idx2 = idx.reshape(r, pack)
        # Pre-offset each slot to its target lane (0..127), send out-of-range
        # indices to -1 (=> all-zero row), and narrow to int8: 4x less index
        # DMA and the lane-padded VMEM index buffer drops to 1/4 of the output
        # block instead of equaling it.  (Single fused XLA elementwise op.)
        offs = jnp.arange(pack, dtype=jnp.int32) * depth
        targets = jnp.where((idx2 >= 0) & (idx2 < depth),
                            idx2 + offs[None, :], -1).astype(jnp.int8)

        tile_r = _pick_row_tile(r, _LANES * itemsize, max_block_bytes)
        out = pl.pallas_call(
            _onehot_packed_kernel,
            out_shape=jax.ShapeDtypeStruct((r, _LANES), dtype),
            grid_spec=pltpu.PrefetchScalarGridSpec(
                num_scalar_prefetch=0,
                grid=(pl.cdiv(r, tile_r),),
                in_specs=[pl.BlockSpec((tile_r, pack), lambda i: (i, 0))],
                out_specs=pl.BlockSpec((tile_r, _LANES), lambda i: (i, 0)),
            ),
            compiler_params=pltpu.CompilerParams(
                dimension_semantics=("parallel",),
                vmem_limit_bytes=_VMEM_LIMIT_BYTES),
            cost_estimate=pl.CostEstimate(
                flops=n_pad * depth, transcendentals=0,
                bytes_accessed=n_pad * depth * itemsize + n_pad),
        )(targets)

        out = out.reshape(n_pad, depth)       # free reshape (same bytes)
        if n_pad != n:
            # TODO(synk): this slice re-copies the whole output; pad n to a
            # multiple of `pack` upstream (or consume the padded array) to keep
            # the ragged case at the HBM-write roofline too.
            out = out[:n]
        return out.reshape(orig_shape + (depth,))

    # ---- row-major fallback: lane-dense whenever depth % 128 == 0; for small
    # non-dividing depth (e.g. 39) stores are lane-masked (vst.msk) ----
    padded_depth = _round_up(depth, _LANES)
    if padded_depth > _MAX_FULL_DEPTH:
        tile_d = _DEPTH_TILE                 # multiple of 128 -> unmasked stores
        d_steps = pl.cdiv(depth, tile_d)
        out_row_bytes = tile_d * itemsize
    else:
        tile_d = depth                       # full depth in one block
        d_steps = 1
        out_row_bytes = padded_depth * itemsize
    tile_n = _pick_row_tile(n, out_row_bytes, max_block_bytes)

    out = pl.pallas_call(
        _onehot_rowmajor_kernel,
        out_shape=jax.ShapeDtypeStruct((n, depth), dtype),
        grid_spec=pltpu.PrefetchScalarGridSpec(
            num_scalar_prefetch=0,
            grid=(pl.cdiv(n, tile_n), d_steps),
            in_specs=[pl.BlockSpec((tile_n, 1), lambda i, j: (i, 0))],
            out_specs=pl.BlockSpec((tile_n, tile_d), lambda i, j: (i, j)),
        ),
        compiler_params=pltpu.CompilerParams(
            dimension_semantics=("parallel", "parallel"),
            vmem_limit_bytes=_VMEM_LIMIT_BYTES),
        cost_estimate=pl.CostEstimate(
            flops=n * depth, transcendentals=0,
            bytes_accessed=n * depth * itemsize + n * 4),
    )(idx_flat.reshape(n, 1))
    return out.reshape(orig_shape + (depth,))


# ------------------------------- test ----------------------------------------


if __name__ == "__main__":
    key = jax.random.PRNGKey(0)
    ks = jax.random.split(key, 6)

    def check(idx, depth, dtype=jnp.float32, **kw):
        out = jax.block_until_ready(one_hot(idx, depth, dtype=dtype, **kw))
        ref = jax.nn.one_hot(idx, depth, dtype=dtype)
        assert out.shape == idx.shape + (depth,), (out.shape, idx.shape, depth)
        assert out.dtype == jnp.dtype(dtype), out.dtype
        assert bool(jnp.all(out == ref)), f"mismatch depth={depth} dtype={dtype}"

    # 1) packed hot path (depth divides 128, n % pack == 0) - attention-OCR shape
    idx = jax.random.randint(ks[0], (2, 8), 0, 16, dtype=jnp.int32)
    check(idx, 16)

    # 2) packed ragged path (n % pack != 0)
    idx = jax.random.randint(ks[1], (2, 7), 0, 16, dtype=jnp.int32)
    check(idx, 16)

    # 3) packed, multi-step grid + partial final row block (forced small tile)
    idx = jax.random.randint(ks[2], (4, 81), 0, 16, dtype=jnp.int32)
    check(idx, 16, max_block_bytes=16 * 1024)

    # 4) packed, exercises the in-kernel pl.loop chunking (r > _CHUNK_ROWS)
    idx = jax.random.randint(ks[3], (2, 1200), 0, 16, dtype=jnp.int32)
    check(idx, 16)

    # 5) row-major fallback, small depth not dividing 128 (lane-masked stores)
    idx = jax.random.randint(ks[4], (2, 8), 0, 39, dtype=jnp.int32)
    check(idx, 39)

    # 6) row-major fallback, large depth -> 2-D (rows x depth) tiling, bf16 out
    idx = jax.random.randint(ks[5], (2, 8), 0, 2500, dtype=jnp.int32)
    check(idx, 2500, dtype=jnp.bfloat16)

    print("KERNEL_OK")
</pallas_src>

<mosaic_0001>
module attributes {stable_mosaic.version = 11 : i64} {
  func.func @_onehot_packed_kernel(%arg0: i32, %arg1: memref<2x8xi8, #tpu.memory_space<vmem>>, %arg2: memref<2x128xf32, #tpu.memory_space<vmem>>) attributes {dimension_semantics = [#tpu.dimension_semantics<parallel>], iteration_bounds = array<i64: 1>, scalar_prefetch = 0 : i64, scratch_operands = 0 : i64, tpu.core_type = #tpu.core_type<tc>, window_params = [{transform_indices = @transform_0, window_bounds = array<i64: 2, 8>}, {transform_indices = @transform_1, window_bounds = array<i64: 2, 128>}]} {
    %0 = tpu.iota {dimensions = array<i32: 1>} : vector<2x128xi32>
    %c0 = arith.constant 0 : index
    %c0_0 = arith.constant 0 : index
    %1 = vector.load %arg1[%c0, %c0_0] : memref<2x8xi8, #tpu.memory_space<vmem>>, vector<2x8xi8>
    %2 = arith.extsi %1 : vector<2x8xi8> to vector<2x8xi32>
    %3 = vector.extract_strided_slice %2 {offsets = [0, 0], sizes = [2, 1], strides = [1, 1]} : vector<2x8xi32> to vector<2x1xi32>
    %4 = vector.broadcast %3 : vector<2x1xi32> to vector<2x128xi32>
    %5 = arith.cmpi eq, %0, %4 : vector<2x128xi32>
    %6 = vector.extract_strided_slice %2 {offsets = [0, 1], sizes = [2, 1], strides = [1, 1]} : vector<2x8xi32> to vector<2x1xi32>
    %7 = vector.broadcast %6 : vector<2x1xi32> to vector<2x128xi32>
    %8 = arith.cmpi eq, %0, %7 : vector<2x128xi32>
    %9 = vector.extract_strided_slice %2 {offsets = [0, 2], sizes = [2, 1], strides = [1, 1]} : vector<2x8xi32> to vector<2x1xi32>
    %10 = vector.broadcast %9 : vector<2x1xi32> to vector<2x128xi32>
    %11 = arith.cmpi eq, %0, %10 : vector<2x128xi32>
    %12 = vector.extract_strided_slice %2 {offsets = [0, 3], sizes = [2, 1], strides = [1, 1]} : vector<2x8xi32> to vector<2x1xi32>
    %13 = vector.broadcast %12 : vector<2x1xi32> to vector<2x128xi32>
    %14 = arith.cmpi eq, %0, %13 : vector<2x128xi32>
    %15 = vector.extract_strided_slice %2 {offsets = [0, 4], sizes = [2, 1], strides = [1, 1]} : vector<2x8xi32> to vector<2x1xi32>
    %16 = vector.broadcast %15 : vector<2x1xi32> to vector<2x128xi32>
    %17 = arith.cmpi eq, %0, %16 : vector<2x128xi32>
    %18 = vector.extract_strided_slice %2 {offsets = [0, 5], sizes = [2, 1], strides = [1, 1]} : vector<2x8xi32> to vector<2x1xi32>
    %19 = vector.broadcast %18 : vector<2x1xi32> to vector<2x128xi32>
    %20 = arith.cmpi eq, %0, %19 : vector<2x128xi32>
    %21 = vector.extract_strided_slice %2 {offsets = [0, 6], sizes = [2, 1], strides = [1, 1]} : vector<2x8xi32> to vector<2x1xi32>
    %22 = vector.broadcast %21 : vector<2x1xi32> to vector<2x128xi32>
    %23 = arith.cmpi eq, %0, %22 : vector<2x128xi32>
    %24 = vector.extract_strided_slice %2 {offsets = [0, 7], sizes = [2, 1], strides = [1, 1]} : vector<2x8xi32> to vector<2x1xi32>
    %25 = vector.broadcast %24 : vector<2x1xi32> to vector<2x128xi32>
    %26 = arith.cmpi eq, %0, %25 : vector<2x128xi32>
    %27 = arith.ori %5, %8 : vector<2x128xi1>
    %28 = arith.ori %11, %14 : vector<2x128xi1>
    %29 = arith.ori %17, %20 : vector<2x128xi1>
    %30 = arith.ori %23, %26 : vector<2x128xi1>
    %31 = arith.ori %27, %28 : vector<2x128xi1>
    %32 = arith.ori %29, %30 : vector<2x128xi1>
    %33 = arith.ori %31, %32 : vector<2x128xi1>
    %34 = arith.extui %33 : vector<2x128xi1> to vector<2x128xi32>
    %35 = arith.sitofp %34 : vector<2x128xi32> to vector<2x128xf32>
    %c0_1 = arith.constant 0 : index
    %c0_2 = arith.constant 0 : index
    %36 = vector.load %arg2[%c0_1, %c0_2] : memref<2x128xf32, #tpu.memory_space<vmem>>, vector<2x128xf32>
    tpu.vector_store %arg2[%c0_1, %c0_2], %35 {strides = array<i32>} : memref<2x128xf32, #tpu.memory_space<vmem>>, vector<2x128xf32>,
    return
  }
  func.func @transform_0(%arg0: i32) -> (i32, i32) {
    %c0_i32 = arith.constant 0 : i32
    %c0_i32_0 = arith.constant 0 : i32
    return %arg0, %c0_i32 : i32, i32
  }
  func.func @transform_1(%arg0: i32) -> (i32, i32) {
    %c0_i32 = arith.constant 0 : i32
    %c0_i32_0 = arith.constant 0 : i32
    return %arg0, %c0_i32 : i32, i32
  }
}

</mosaic_0001>

<bundles_post_ra>
// kernel: tpu_custom_call.1
= control target key start
LH: loop header
LB: loop body
LE: loop exit
PB: predicated region body
PF: predicated region fallthrough
CT: control target
= control target key end

     0   :  { %6 = vsyncpa [#allocation3], 0  ;;  %s238_s0 = inlined_call_operand.hbm [shape: s8[2,8], index: 0, kind: input, shape index: {}]   ;;  %s239_s1 = inlined_call_operand.hbm [shape: f32[2,128], index: 1, kind: output, shape index: {}]  }
   0x1   :  { %7 = vsyncpa [#allocation4], 0  ;;  %s204_s6 = smov [#allocation2]  }
   0x2   :  { %s14_s7 = sshll.u32 %s204_s6, 4  ;;  %s15_s7 = int_to_ptr.vmem [resolvable:$true] %s14_s7 }
   0x3   :  { %s168_s8 = scalar_lea.vmem %s15_s7, 16  ;;  %s172_s9 = scalar_lea.vmem %s15_s7, 32 }
   0x4   :  { %p169_p0 = scmp.ne.s32.totalorder %s15_s7, %s168_s8  ;;  %p173_p1 = scmp.lt.s32.totalorder %s15_s7, %s15_s7 }
   0x5   :  { %p174_p2 = scmp.lt.s32.totalorder %s172_s9, %s168_s8 }
   0x7   :  { %p175_p3 = por %p174_p2, %p173_p1 }
   0x9   :  { %p176_p4 = pnand %p175_p3, %p169_p0 }
   0xb   :  { %179 = shalt.err (!%p176_p4)
}
   0xc   :  { %17 = dma.hbm_to_vmem [thread:$0]  %s238_s0, 16, %s15_s7, [#allocation3]  }
   0xd   :  { %200 = dma.done.wait [#allocation3], 16  }
   0xe   :  { %201 = vsyncadd [#allocation3], 4294967280  ;;  %v205_v0 = vmov 2   ;;  %v206_v1 = vmov 0   ;;  %v23_v2 = vld [vmem:[#allocation2] sm:$0x1]  ;;  %v21_v11 = vlaneseq }
   0xf   :  { %153 = vset.pattern.permute.xlu1 %v205_v0  ;;  %151 = vset.pattern.permute.xlu0 %v206_v1  ;;  %v24_v3 = vunpack.c.0.s8 %v23_v2  ;;  %v207_v4 = vmov 3   ;;  %v208_v5 = vmov 1   ;;  %v209_v6 = vmov 4   ;;  %s214_s0 = smov [#allocation5]  }
  0x10   :  { %v210_v7 = vmov 5   ;;  %v211_v8 = vmov 6   ;;  %v212_v9 = vmov 7   ;;  %v213_v12 = vmov 839922192   ;;  %s129_s12 = sshll.u32 %s214_s0, 4  ;;  %s130_s12 = int_to_ptr.vmem [resolvable:$true] %s129_s12 }
  0x11   :  { %48 = vperm.xlu1 %153, %v24_v3   ;;  %26 = vperm.xlu0 %151, %v24_v3   ;;  %v29_v13 = vunpack.c.l.s4 %v213_v12  ;;  %v32_v16 = vshrl.u32 %v21_v11, 7  ;;  %v22_v24 = vand.u32 127, %v21_v11  ;;  %v215_v34 = vmov 0.0   ;;  %s180_s13 = scalar_lea.vmem %s130_s12, 32  ;;  %p185_p6 = scmp.lt.s32.totalorder %s130_s12, %s130_s12 }
  0x12   :  { %p181_p5 = scmp.ne.s32.totalorder %s130_s12, %s180_s13  ;;  %p186_p7 = scmp.lt.s32.totalorder %s180_s13, %s180_s13 }
  0x13   :  { %v30_v15 = vunpack.c.0.s8 %v29_v13 }
  0x14   :  { %p187_p8 = por %p186_p7, %p185_p6 }
  0x15   :  { %154 = vset.pattern.permute.xlu1 %v207_v4  ;;  %152 = vset.pattern.permute.xlu0 %v208_v5  ;;  %v33_v19 = vsub.s32 %v30_v15, %v32_v16 }
  0x16   :  { %59 = vperm.xlu1 %154, %v24_v3   ;;  %37 = vperm.xlu0 %152, %v24_v3   ;;  %p188_p9 = pnand %p187_p8, %p181_p5 }
  0x1a   :  { %155 = vset.pattern.permute.xlu1 %v209_v6  ;;  %156 = vset.pattern.permute.xlu0 %v210_v7 }
  0x1b   :  { %70 = vperm.xlu1 %155, %v24_v3   ;;  %81 = vperm.xlu0 %156, %v24_v3  }
  0x1f   :  { %157 = vset.pattern.permute.xlu1 %v211_v8  ;;  %159 = vset.pattern.permute.xlu0 %v212_v9 }
  0x20   :  { %92 = vperm.xlu1 %157, %v24_v3  }
  0x24   :  { %158 = vset.pattern.permute.xlu1 %v212_v9 }
  0x25   :  { %103 = vperm.xlu1 %158, %v24_v3  }
  0x8c   :  { %v49_v10 = vpop.permute.xlu1 %48  ;;  %v27_v14 = vpop.permute.xlu0 %26 }
  0x8d   :  { %v34_v22 = vrot.slane %v27_v14, %v33_v19  ;;  %v56_v25 = vrot.slane %v49_v10, %v33_v19 }
  0x8f   :  { %vm35_vm1 = vcmp.eq.s32.totalorder %v22_v24, %v34_v22  ;;  %vm57_vm3 = vcmp.eq.s32.totalorder %v22_v24, %v56_v25 }
  0x91   :  { %v60_v17 = vpop.permute.xlu1 %59  ;;  %v38_v18 = vpop.permute.xlu0 %37 }
  0x92   :  { %v67_v21 = vrot.slane %v60_v17, %v33_v19  ;;  %v45_v23 = vrot.slane %v38_v18, %v33_v19 }
  0x94   :  { %vm229_vm0 = vcmp.eq.s32.totalorder %v22_v24, %v67_v21  ;;  %vm46_vm2 = vcmp.eq.s32.totalorder %v22_v24, %v45_v23 }
  0x95   :  { %vm114_vm4 = vmor %vm57_vm3, %vm229_vm0 }
  0x96   :  { %v71_v20 = vpop.permute.xlu1 %70  ;;  %v82_v26 = vpop.permute.xlu0 %81  ;;  %vm113_vm5 = vmor %vm35_vm1, %vm46_vm2 }
  0x97   :  { %v78_v29 = vrot.slane %v71_v20, %v33_v19  ;;  %v89_v30 = vrot.slane %v82_v26, %v33_v19  ;;  %vm117_vm8 = vmor %vm113_vm5, %vm114_vm4 }
  0x99   :  { %vm79_vm6 = vcmp.eq.s32.totalorder %v22_v24, %v78_v29  ;;  %vm90_vm7 = vcmp.eq.s32.totalorder %v22_v24, %v89_v30 }
  0x9a   :  { %vm115_vm9 = vmor %vm79_vm6, %vm90_vm7 }
  0x9b   :  { %v93_v28 = vpop.permute.xlu1 %92 }
  0x9c   :  { %v100_v31 = vrot.slane %v93_v28, %v33_v19 }
  0x9e   :  { %vm101_vm10 = vcmp.eq.s32.totalorder %v22_v24, %v100_v31 }
  0xa0   :  { %v104_v32 = vpop.permute.xlu1 %103 }
  0xa1   :  { %v111_v33 = vrot.slane %v104_v32, %v33_v19 }
  0xa3   :  { %vm112_vm11 = vcmp.eq.s32.totalorder %v22_v24, %v111_v33 }
  0xa4   :  { %vm116_vm12 = vmor %vm101_vm10, %vm112_vm11 }
  0xa5   :  { %vm118_vm13 = vmor %vm115_vm9, %vm116_vm12 }
  0xa6   :  { %vm119_vm14 = vmor %vm117_vm8, %vm118_vm13 }
  0xa7   :  { %v138_v35 = vsel %vm119_vm14, 1.0, %v215_v34 }
  0xa8   :  { %122 = vst [vmem:[#allocation5] sm:$0x3] %v138_v35 }
  0xa9   :  { %191 = shalt.err (!%p188_p9)
}
  0xaa   :  { %132 = dma.vmem_to_hbm [thread:$0]  %s130_s12, 32, %s239_s1, [#allocation4]  }
  0xab   :  { %202 = dma.done.wait [#allocation4], 32  }
  0xac   :  { %203 = vsyncadd [#allocation4], 4294967264 }
  0xad   :  { %136 = vsyncpa [#allocation3], 1 }
  0xae   :  { %137 = vsyncpa [#allocation4], 1 }

</bundles_post_ra>
